<compile_context>
chip_gen: v7x
topology: tpu7x:2x2x1
jax: 0.10.0
libtpu: 0.0.40
codegen_flags: <defaults>
</compile_context>

<pallas_src>
import functools

import jax
import jax.numpy as jnp
from jax import lax
from jax.experimental import pallas as pl
from jax.experimental.pallas import tpu as pltpu


# ---------------------------------------------------------------------------
# Velocity: LA ** ve  (elementwise, scalar exponent)
# ---------------------------------------------------------------------------

def _pow_scalar_kernel(ve_ref, x_ref, o_ref):
    # ve_ref: (1,) f32 scalar in SMEM; x_ref/o_ref: (row_tile, lanes) VMEM tiles.
    v = ve_ref[0]
    x = x_ref[...].astype(jnp.float32)            # cast inside the kernel (no extra HBM pass)
    o_ref[...] = jnp.power(x, v).astype(o_ref.dtype)


def _pow_int_kernel(x_ref, o_ref, *, exponent):
    # Static small-integer exponent: exponentiation by squaring, unrolled at trace
    # time -> pure VPU multiplies (no exp/log on the EUP).
    x = x_ref[...].astype(jnp.float32)
    e = int(exponent)
    acc = None
    base = x
    while e > 0:
        if e & 1:
            acc = base if acc is None else acc * base
        e >>= 1
        if e > 0:
            base = base * base
    if acc is None:                               # exponent == 0
        acc = jnp.ones_like(x)
    o_ref[...] = acc.astype(o_ref.dtype)


def velocity_forward(LA, ve, *, block_bytes=1 << 20, min_kernel_elems=8192):
    """Compute LA ** ve (elementwise, scalar exponent) with a Pallas kernel.

    LA: any-shape float array.  ve: shape-(1,) float parameter.
    """
    LA = jnp.asarray(LA)
    ve = jnp.asarray(ve, dtype=jnp.float32).reshape(-1)
    n = LA.size
    orig_shape = LA.shape
    orig_dtype = LA.dtype

    # Tiny inputs: a single fused XLA elementwise op beats kernel-launch + grid overhead.
    if n < min_kernel_elems:
        return jnp.power(LA.astype(jnp.float32), ve[0]).astype(orig_dtype)

    # If ve is a concrete small non-negative integer (e.g. the init value 7.0),
    # specialise to the repeated-multiplication VPU kernel.
    v_static = None
    try:
        v_host = float(jax.device_get(ve)[0])
        if v_host == round(v_host) and 0.0 <= v_host <= 64.0:
            v_static = int(round(v_host))
    except Exception:
        v_static = None                           # traced exponent -> general kernel

    # Pick a wide, lane-dense layout.  Zero-copy (no pad / no tail slice) whenever the
    # element count divides by a 128-multiple lane width.
    lanes = None
    for cand in (2048, 1024, 512, 256, 128):
        if n % cand == 0:
            lanes = cand
            break

    if lanes is not None:
        rows = n // lanes
        x2d = LA.reshape(rows, lanes)             # metadata-only reshape, no extra HBM pass
        pad_tail = 0
    else:
        # Rare ragged fallback: pad the flat tail up to 128 lanes (pad with 1.0 so that any
        # exponent, including negative/non-integer, stays finite in the padding region).
        lanes = 128
        rows = pl.cdiv(n, lanes)
        pad_tail = rows * lanes - n
        x2d = jnp.pad(LA.reshape(-1), (0, pad_tail), constant_values=1.0)
        x2d = x2d.reshape(rows, lanes)

    # ~1 MiB f32 blocks: big enough to amortise the ~0.35 us per-grid-step overhead,
    # small enough that double-buffered in+out stays far below the scoped-VMEM default.
    row_tile = min(rows, max(8, block_bytes // (4 * lanes)))
    if row_tile < rows:
        row_tile = max(8, (row_tile // 8) * 8)    # sublane-aligned when not full extent
    grid = (pl.cdiv(rows, row_tile),)

    data_spec = pl.BlockSpec((row_tile, lanes), lambda i: (i, 0))

    if v_static is not None:
        kernel = functools.partial(_pow_int_kernel, exponent=v_static)
        out2d = pl.pallas_call(
            kernel,
            out_shape=jax.ShapeDtypeStruct((rows, lanes), orig_dtype),
            grid_spec=pltpu.PrefetchScalarGridSpec(
                num_scalar_prefetch=0,
                grid=grid,
                in_specs=[data_spec],
                out_specs=data_spec,
            ),
            compiler_params=pltpu.CompilerParams(
                dimension_semantics=("parallel",)),
        )(x2d)
    else:
        out2d = pl.pallas_call(
            _pow_scalar_kernel,
            out_shape=jax.ShapeDtypeStruct((rows, lanes), orig_dtype),
            grid_spec=pltpu.PrefetchScalarGridSpec(
                num_scalar_prefetch=0,
                grid=grid,
                in_specs=[
                    pl.BlockSpec(memory_space=pltpu.MemorySpace.SMEM),  # ve scalar
                    data_spec,
                ],
                out_specs=data_spec,
            ),
            compiler_params=pltpu.CompilerParams(
                dimension_semantics=("parallel",)),
        )(ve, x2d)

    if pad_tail:
        return out2d.reshape(-1)[:n].reshape(orig_shape)
    return out2d.reshape(orig_shape)


# ---------------------------------------------------------------------------
# Fused TEDGCN forward kernel (small graph: whole arrays resident in VMEM)
# ---------------------------------------------------------------------------

def _dot_t(a, b):
    # a @ b.T on the MXU without materialising a transpose (contract last dims of both).
    return lax.dot_general(a, b, (((1,), (1,)), ((), ())),
                           preferred_element_type=jnp.float32)


def _tedgcn_fused_kernel(u_ref, vla_ref, x_ref,
                         w1_ref, b1_ref, gamma_ref, beta_ref,
                         w2_ref, b2_ref,
                         out_ref, hid_ref, *, use_log_softmax):
    f32 = jnp.float32
    U = u_ref[...].astype(f32)                    # (N, N)
    vla = vla_ref[...].astype(f32)                # (1, N)  = La ** ve
    X = x_ref[...].astype(f32)                    # (N, Cin)

    # out_A = (U @ diag(V_La)) @ U^T ; out = out_A @ X
    S = U * vla                                   # column scaling == U @ diag(V_La)
    A = _dot_t(S, U)                              # (N, N)   S @ U^T
    H = jnp.dot(A, X, preferred_element_type=f32)        # (N, Cin)

    # W: Linear(in_channels -> hidden)   H @ W^T + b
    H = _dot_t(H, w1_ref[...].astype(f32)) + b1_ref[...].astype(f32)   # (N, hidden)
    hid_ref[...] = H.astype(hid_ref.dtype)        # hidden_emd

    # BatchNorm1d over the node/batch dimension (training-style batch statistics).
    # TODO(synk): eval-mode BatchNorm (running stats) not represented; batch stats used.
    mean = jnp.mean(H, axis=0, keepdims=True)
    var = jnp.mean(jnp.square(H - mean), axis=0, keepdims=True)
    H = (H - mean) * lax.rsqrt(var + 1e-5)
    H = H * gamma_ref[...].astype(f32) + beta_ref[...].astype(f32)

    # ReLU
    H = jnp.maximum(H, 0.0)
    # TODO(synk): nn.Dropout(p) is applied as identity (inference-mode forward; no RNG).

    # MLP: Linear(hidden -> out_channels)   H @ W2^T + b2
    logits = _dot_t(H, w2_ref[...].astype(f32)) + b2_ref[...].astype(f32)   # (N, out)

    if use_log_softmax:
        m = jnp.max(logits, axis=1, keepdims=True)
        z = logits - m
        lse = jnp.log(jnp.sum(jnp.exp(z), axis=1, keepdims=True))
        out_ref[...] = (z - lse).astype(out_ref.dtype)
    else:
        out_ref[...] = (1.0 / (1.0 + jnp.exp(-logits))).astype(out_ref.dtype)


def tedgcn_forward(X, La, U, params, *, softmax=True):
    """Full TEDGCN forward. Returns (log_softmax(out) or sigmoid(out), hidden_emd)."""
    N, _in_c = X.shape
    hidden = params["W_w"].shape[0]
    out_c = params["MLP_w"].shape[0]

    # Velocity module (Pallas kernel; tiny La takes the documented XLA bypass).
    V_La = velocity_forward(La, params["ve"])

    vmem = pl.BlockSpec(memory_space=pltpu.MemorySpace.VMEM)
    kernel = functools.partial(_tedgcn_fused_kernel, use_log_softmax=softmax)
    out, hidden_emd = pl.pallas_call(
        kernel,
        out_shape=(
            jax.ShapeDtypeStruct((N, out_c), jnp.float32),
            jax.ShapeDtypeStruct((N, hidden), jnp.float32),
        ),
        in_specs=[vmem] * 9,
        out_specs=(vmem, vmem),
    )(
        U.astype(jnp.float32),                               # (N, N)
        V_La.reshape(1, N).astype(jnp.float32),              # (1, N)
        X.astype(jnp.float32),                               # (N, in_c)
        params["W_w"].astype(jnp.float32),                   # (hidden, in_c)
        params["W_b"].reshape(1, hidden).astype(jnp.float32),
        params["bn_gamma"].reshape(1, hidden).astype(jnp.float32),
        params["bn_beta"].reshape(1, hidden).astype(jnp.float32),
        params["MLP_w"].astype(jnp.float32),                 # (out_c, hidden)
        params["MLP_b"].reshape(1, out_c).astype(jnp.float32),
    )
    return out, hidden_emd


# ---------------------------------------------------------------------------
# Plain-JAX reference for verification
# ---------------------------------------------------------------------------

def tedgcn_reference(X, La, U, params, *, softmax=True):
    hp = lax.Precision.HIGHEST
    vla = jnp.power(La, params["ve"][0])
    A = jnp.dot(U * vla[None, :], U.T, precision=hp)
    H = jnp.dot(A, X, precision=hp)
    H = jnp.dot(H, params["W_w"].T, precision=hp) + params["W_b"]
    hid = H
    mean = jnp.mean(H, axis=0, keepdims=True)
    var = jnp.mean(jnp.square(H - mean), axis=0, keepdims=True)
    H = (H - mean) * lax.rsqrt(var + 1e-5)
    H = H * params["bn_gamma"] + params["bn_beta"]
    H = jnp.maximum(H, 0.0)
    logits = jnp.dot(H, params["MLP_w"].T, precision=hp) + params["MLP_b"]
    if softmax:
        out = jax.nn.log_softmax(logits, axis=1)
    else:
        out = jax.nn.sigmoid(logits)
    return out, hid


# ---------------------------------------------------------------------------
# Demo / self-check
# ---------------------------------------------------------------------------

if __name__ == "__main__":
    key = jax.random.PRNGKey(0)
    kLa, kU, kX, kW1, kb1, kW2, kb2, kbig, kodd = jax.random.split(key, 9)

    # Small graph consistent with the module: N nodes, in_channels, hidden_dim, out_channels.
    N, in_c, hidden, out_c = 64, 16, 32, 8

    La = jax.random.uniform(kLa, (N,), jnp.float32, minval=0.5, maxval=1.2)   # eigenvalues > 0
    U = jax.random.normal(kU, (N, N), jnp.float32) * (1.0 / float(N) ** 0.5)  # eigenvector-like
    X = jax.random.normal(kX, (N, in_c), jnp.float32)

    params = {
        "ve": jnp.array([7.0], dtype=jnp.float32),           # Velocity(init_v=7)
        "W_w": 0.2 * jax.random.normal(kW1, (hidden, in_c), jnp.float32),
        "W_b": 0.1 * jax.random.normal(kb1, (hidden,), jnp.float32),
        "bn_gamma": jnp.ones((hidden,), jnp.float32),
        "bn_beta": jnp.zeros((hidden,), jnp.float32),
        "MLP_w": 0.2 * jax.random.normal(kW2, (out_c, hidden), jnp.float32),
        "MLP_b": 0.1 * jax.random.normal(kb2, (out_c,), jnp.float32),
    }

    # Full TEDGCN forward (fused Pallas kernel).
    log_probs, hidden_emd = tedgcn_forward(X, La, U, params, softmax=True)
    log_probs, hidden_emd = jax.block_until_ready((log_probs, hidden_emd))

    ref_log, ref_hid = tedgcn_reference(X, La, U, params, softmax=True)
    assert log_probs.shape == (N, out_c) and hidden_emd.shape == (N, hidden)
    assert jnp.allclose(hidden_emd, ref_hid, rtol=2e-2, atol=2e-2)
    assert jnp.allclose(log_probs, ref_log, rtol=2e-2, atol=2e-2)

    # Sigmoid branch as well (softmax=False).
    sig_out, _ = tedgcn_forward(X, La, U, params, softmax=False)
    ref_sig, _ = tedgcn_reference(X, La, U, params, softmax=False)
    sig_out = jax.block_until_ready(sig_out)
    assert jnp.allclose(sig_out, ref_sig, rtol=2e-2, atol=2e-2)

    # Velocity elementwise kernel — integer-exponent VPU fast path, zero-copy wide-lane layout.
    LA_big = jax.random.uniform(kbig, (2, 4, 128, 128), jnp.float32, minval=0.5, maxval=1.5)
    out_int = jax.block_until_ready(velocity_forward(LA_big, jnp.array([7.0], jnp.float32)))
    assert jnp.allclose(out_int, jnp.power(LA_big, 7.0), rtol=1e-4, atol=1e-4)

    # General (non-integer) exponent path with the SMEM scalar.
    out_gen = jax.block_until_ready(velocity_forward(LA_big, jnp.array([2.5], jnp.float32)))
    assert jnp.allclose(out_gen, jnp.power(LA_big, 2.5), rtol=1e-4, atol=1e-4)

    # Ragged shape forced through the kernel -> padded fallback path.
    LA_odd = jax.random.uniform(kodd, (3, 5, 7, 11), jnp.float32, minval=0.5, maxval=1.5)
    out_odd = jax.block_until_ready(
        velocity_forward(LA_odd, jnp.array([3.0], jnp.float32), min_kernel_elems=0))
    assert out_odd.shape == LA_odd.shape
    assert jnp.allclose(out_odd, jnp.power(LA_odd, 3.0), rtol=1e-4, atol=1e-4)

    print("KERNEL_OK")
</pallas_src>

<mosaic_0001>
module attributes {stable_mosaic.version = 11 : i64} {
  func.func @_tedgcn_fused_kernel(%arg0: memref<64x64xf32, #tpu.memory_space<vmem>>, %arg1: memref<1x64xf32, #tpu.memory_space<vmem>>, %arg2: memref<64x16xf32, #tpu.memory_space<vmem>>, %arg3: memref<32x16xf32, #tpu.memory_space<vmem>>, %arg4: memref<1x32xf32, #tpu.memory_space<vmem>>, %arg5: memref<1x32xf32, #tpu.memory_space<vmem>>, %arg6: memref<1x32xf32, #tpu.memory_space<vmem>>, %arg7: memref<8x32xf32, #tpu.memory_space<vmem>>, %arg8: memref<1x8xf32, #tpu.memory_space<vmem>>, %arg9: memref<64x8xf32, #tpu.memory_space<vmem>>, %arg10: memref<64x32xf32, #tpu.memory_space<vmem>>) attributes {dimension_semantics = [], scalar_prefetch = 0 : i64, scratch_operands = 0 : i64, tpu.core_type = #tpu.core_type<tc>} {
    %c0 = arith.constant 0 : index
    %c0_0 = arith.constant 0 : index
    %0 = vector.load %arg0[%c0, %c0_0] : memref<64x64xf32, #tpu.memory_space<vmem>>, vector<64x64xf32>
    %c0_1 = arith.constant 0 : index
    %c0_2 = arith.constant 0 : index
    %1 = vector.load %arg1[%c0_1, %c0_2] : memref<1x64xf32, #tpu.memory_space<vmem>>, vector<1x64xf32>
    %c0_3 = arith.constant 0 : index
    %c0_4 = arith.constant 0 : index
    %2 = vector.load %arg2[%c0_3, %c0_4] : memref<64x16xf32, #tpu.memory_space<vmem>>, vector<64x16xf32>
    %3 = vector.broadcast %1 : vector<1x64xf32> to vector<64x64xf32>
    %4 = arith.mulf %0, %3 : vector<64x64xf32>
    %cst = arith.constant dense<0.000000e+00> : vector<64x64xf32>
    %5 = tpu.matmul %4, %0, %cst {dimension_numbers = #tpu.dot_dimension_numbers<[1], [1], [0], [0], [0, 0, 1, 0], [], []>} : vector<64x64xf32>, vector<64x64xf32>, vector<64x64xf32> -> vector<64x64xf32>
    %cst_5 = arith.constant dense<0.000000e+00> : vector<64x16xf32>
    %6 = tpu.matmul %5, %2, %cst_5 {dimension_numbers = #tpu.dot_dimension_numbers<[1], [0], [0], [1], [0, 0, 1, 1], [], []>} : vector<64x64xf32>, vector<64x16xf32>, vector<64x16xf32> -> vector<64x16xf32>
    %c0_6 = arith.constant 0 : index
    %c0_7 = arith.constant 0 : index
    %7 = vector.load %arg3[%c0_6, %c0_7] : memref<32x16xf32, #tpu.memory_space<vmem>>, vector<32x16xf32>
    %cst_8 = arith.constant dense<0.000000e+00> : vector<64x32xf32>
    %8 = tpu.matmul %6, %7, %cst_8 {dimension_numbers = #tpu.dot_dimension_numbers<[1], [1], [0], [0], [0, 0, 1, 0], [], []>} : vector<64x16xf32>, vector<32x16xf32>, vector<64x32xf32> -> vector<64x32xf32>
    %c0_9 = arith.constant 0 : index
    %c0_10 = arith.constant 0 : index
    %9 = vector.load %arg4[%c0_9, %c0_10] : memref<1x32xf32, #tpu.memory_space<vmem>>, vector<1x32xf32>
    %10 = vector.broadcast %9 : vector<1x32xf32> to vector<64x32xf32>
    %11 = arith.addf %8, %10 : vector<64x32xf32>
    %c0_11 = arith.constant 0 : index
    %c0_12 = arith.constant 0 : index
    %12 = vector.load %arg10[%c0_11, %c0_12] : memref<64x32xf32, #tpu.memory_space<vmem>>, vector<64x32xf32>
    tpu.vector_store %arg10[%c0_11, %c0_12], %11 {strides = array<i32>} : memref<64x32xf32, #tpu.memory_space<vmem>>, vector<64x32xf32>,
    %cst_13 = arith.constant dense<0.000000e+00> : vector<32xf32>
    %13 = vector.multi_reduction <add>, %11, %cst_13 [0] : vector<64x32xf32> to vector<32xf32>
    %14 = vector.shape_cast %13 : vector<32xf32> to vector<1x32xf32>
    %cst_14 = arith.constant 6.400000e+01 : f32
    %15 = vector.broadcast %cst_14 : f32 to vector<1x32xf32>
    %16 = arith.divf %14, %15 : vector<1x32xf32>
    %17 = vector.broadcast %16 : vector<1x32xf32> to vector<64x32xf32>
    %18 = arith.subf %11, %17 : vector<64x32xf32>
    %19 = arith.mulf %18, %18 : vector<64x32xf32>
    %cst_15 = arith.constant dense<0.000000e+00> : vector<32xf32>
    %20 = vector.multi_reduction <add>, %19, %cst_15 [0] : vector<64x32xf32> to vector<32xf32>
    %21 = vector.shape_cast %20 : vector<32xf32> to vector<1x32xf32>
    %cst_16 = arith.constant 6.400000e+01 : f32
    %22 = vector.broadcast %cst_16 : f32 to vector<1x32xf32>
    %23 = arith.divf %21, %22 : vector<1x32xf32>
    %24 = vector.broadcast %16 : vector<1x32xf32> to vector<64x32xf32>
    %25 = arith.subf %11, %24 : vector<64x32xf32>
    %cst_17 = arith.constant 9.99999974E-6 : f32
    %26 = vector.broadcast %cst_17 : f32 to vector<1x32xf32>
    %27 = arith.addf %23, %26 : vector<1x32xf32>
    %28 = math.rsqrt %27 : vector<1x32xf32>
    %29 = vector.broadcast %28 : vector<1x32xf32> to vector<64x32xf32>
    %30 = arith.mulf %25, %29 : vector<64x32xf32>
    %c0_18 = arith.constant 0 : index
    %c0_19 = arith.constant 0 : index
    %31 = vector.load %arg5[%c0_18, %c0_19] : memref<1x32xf32, #tpu.memory_space<vmem>>, vector<1x32xf32>
    %32 = vector.broadcast %31 : vector<1x32xf32> to vector<64x32xf32>
    %33 = arith.mulf %30, %32 : vector<64x32xf32>
    %c0_20 = arith.constant 0 : index
    %c0_21 = arith.constant 0 : index
    %34 = vector.load %arg6[%c0_20, %c0_21] : memref<1x32xf32, #tpu.memory_space<vmem>>, vector<1x32xf32>
    %35 = vector.broadcast %34 : vector<1x32xf32> to vector<64x32xf32>
    %36 = arith.addf %33, %35 : vector<64x32xf32>
    %cst_22 = arith.constant 0.000000e+00 : f32
    %37 = vector.broadcast %cst_22 : f32 to vector<64x32xf32>
    %38 = arith.maximumf %36, %37 : vector<64x32xf32>
    %c0_23 = arith.constant 0 : index
    %c0_24 = arith.constant 0 : index
    %39 = vector.load %arg7[%c0_23, %c0_24] : memref<8x32xf32, #tpu.memory_space<vmem>>, vector<8x32xf32>
    %cst_25 = arith.constant dense<0.000000e+00> : vector<64x8xf32>
    %40 = tpu.matmul %38, %39, %cst_25 {dimension_numbers = #tpu.dot_dimension_numbers<[1], [1], [0], [0], [0, 0, 1, 0], [], []>} : vector<64x32xf32>, vector<8x32xf32>, vector<64x8xf32> -> vector<64x8xf32>
    %c0_26 = arith.constant 0 : index
    %c0_27 = arith.constant 0 : index
    %41 = vector.load %arg8[%c0_26, %c0_27] : memref<1x8xf32, #tpu.memory_space<vmem>>, vector<1x8xf32>
    %42 = vector.broadcast %41 : vector<1x8xf32> to vector<64x8xf32>
    %43 = arith.addf %40, %42 : vector<64x8xf32>
    %cst_28 = arith.constant dense<0xFF800000> : vector<64xf32>
    %44 = vector.multi_reduction <maximumf>, %43, %cst_28 [1] : vector<64x8xf32> to vector<64xf32>
    %45 = vector.shape_cast %44 : vector<64xf32> to vector<64x1xf32>
    %46 = vector.broadcast %45 : vector<64x1xf32> to vector<64x8xf32>
    %47 = arith.subf %43, %46 : vector<64x8xf32>
    %48 = math.exp %47 : vector<64x8xf32>
    %cst_29 = arith.constant dense<0.000000e+00> : vector<64xf32>
    %49 = vector.multi_reduction <add>, %48, %cst_29 [1] : vector<64x8xf32> to vector<64xf32>
    %50 = vector.shape_cast %49 : vector<64xf32> to vector<64x1xf32>
    %51 = math.log %50 : vector<64x1xf32>
    %52 = vector.broadcast %51 : vector<64x1xf32> to vector<64x8xf32>
    %53 = arith.subf %47, %52 : vector<64x8xf32>
    %c0_30 = arith.constant 0 : index
    %c0_31 = arith.constant 0 : index
    %54 = vector.load %arg9[%c0_30, %c0_31] : memref<64x8xf32, #tpu.memory_space<vmem>>, vector<64x8xf32>
    tpu.vector_store %arg9[%c0_30, %c0_31], %53 {strides = array<i32>} : memref<64x8xf32, #tpu.memory_space<vmem>>, vector<64x8xf32>,
    return
  }
}

</mosaic_0001>

<bundles_post_ra>
// kernel: tpu_custom_call.1
= control target key start
LH: loop header
LB: loop body
LE: loop exit
PB: predicated region body
PF: predicated region fallthrough
CT: control target
= control target key end

     0   :  { %vm65_vm0 = vcmask 523264   ;;  %vm359_vm2 = vcmask 130048   ;;  %vm501_vm4 = vcmask 261120   ;;  %vm759_vm5 = vcmask 64512   ;;  %s1486_s0 = inlined_call_operand.vmem [shape: f32[64,64], index: 0, kind: input, shape index: {}]   ;;  %s1487_s1 = inlined_call_operand.vmem [shape: f32[1,64], index: 1, kind: input, shape index: {}]   ;;  %s1488_s2 = inlined_call_operand.vmem [shape: f32[64,16], index: 2, kind: input, shape index: {}]   ;;  %s1489_s3 = inlined_call_operand.vmem [shape: f32[32,16], index: 3, kind: input, shape index: {}]   ;;  %s1490_s7 = inlined_call_operand.vmem [shape: f32[8,32], index: 7, kind: input, shape index: {}]   ;;  %s1491_s4 = inlined_call_operand.vmem [shape: f32[1,32], index: 4, kind: input, shape index: {}]   ;;  %s1492_s10 = inlined_call_operand.vmem [shape: f32[64,32], index: 10, kind: output, shape index: {1}]   ;;  %s1493_s5 = inlined_call_operand.vmem [shape: f32[1,32], index: 5, kind: input, shape index: {}]   ;;  %s1494_s6 = inlined_call_operand.vmem [shape: f32[1,32], index: 6, kind: input, shape index: {}]   ;;  %s1495_s8 = inlined_call_operand.vmem [shape: f32[1,8], index: 8, kind: input, shape index: {}]   ;;  %s1496_s9 = inlined_call_operand.vmem [shape: f32[64,8], index: 9, kind: output, shape index: {0}]  }
   0x1   :  { %v34_v0 = vld [vmem:[%s1486_s0] sm:$0xff]  ;;  %v35_v1 = vld [vmem:[%s1486_s0 + $0x8] sm:$0xff]  ;;  %vm1219_vm1 = vmpackc.low %vm65_vm0, %vm65_vm0 }
   0x2   :  { %v872_v2 = vld [vmem:[%s1487_s1] ss:$0 sm:$0xff]  ;;  %v1065_v3 = vpack.c.bf16 %v35_v1, %v34_v0  ;;  %v36_v5 = vld [vmem:[%s1486_s0 + $0x10] sm:$0xff]  ;;  %v37_v6 = vld [vmem:[%s1486_s0 + $0x18] sm:$0xff] }
   0x3   :  { %v57_v7 = vmul.f32 %v872_v2, %v34_v0  ;;  %v1071_v8 = vpack.c.bf16 %v37_v6, %v36_v5  ;;  %v43_v9 = vld [vmem:[%s1488_s2] sm:$0xff]  ;;  %v44_v10 = vld [vmem:[%s1488_s2 + $0x8] sm:$0xff]  ;;  %v45_v12 = vld [vmem:[%s1488_s2 + $0x10] sm:$0xff]  ;;  %v58_v27 = vmul.f32 %v872_v2, %v35_v1  ;;  %v59_v28 = vmul.f32 %v872_v2, %v36_v5 }
   0x4   :  { %1067 = vmatprep.subr.msk.bf16.mxu0 %vm1219_vm1, %v1065_v3  ;;  %v1089_v11 = vpack.c.bf16 %v44_v10, %v43_v9  ;;  %v46_v13 = vld [vmem:[%s1488_s2 + $0x18] sm:$0xff]  ;;  %v47_v15 = vld [vmem:[%s1488_s2 + $0x20] sm:$0xff]  ;;  %v48_v16 = vld [vmem:[%s1488_s2 + $0x28] sm:$0xff]  ;;  %v60_v29 = vmul.f32 %v872_v2, %v37_v6 }
   0x5   :  { %991 = vmatprep.mubr.msk.f32.mxu0 %vm65_vm0, %v57_v7  ;;  %1070 = vmatpush3.bf16.xpose.msk.msra.mxu0 %vm1219_vm1, %v1065_v3  ;;  %v1093_v14 = vpack.c.bf16 %v46_v13, %v45_v12  ;;  %v38_v17 = vld [vmem:[%s1486_s0 + $0x20] sm:$0xff]  ;;  %v39_v18 = vld [vmem:[%s1486_s0 + $0x28] sm:$0xff]  ;;  %v1097_v19 = vpack.c.bf16 %v48_v16, %v47_v15  ;;  %v49_v21 = vld [vmem:[%s1488_s2 + $0x30] sm:$0xff] }
   0x6   :  { %1073 = vmatprep.subr.msk.bf16.mxu0 %vm1219_vm1, %v1071_v8  ;;  %1090 = vmatprep.subr.bf16.mxu1 %v1089_v11  ;;  %v1077_v20 = vpack.c.bf16 %v39_v18, %v38_v17  ;;  %v50_v22 = vld [vmem:[%s1488_s2 + $0x38] sm:$0xff]  ;;  %v40_v24 = vld [vmem:[%s1486_s0 + $0x30] sm:$0xff]  ;;  %v61_v30 = vmul.f32 %v872_v2, %v38_v17  ;;  %v62_v31 = vmul.f32 %v872_v2, %v39_v18  ;;  %v348_v34 = vld [vmem:[%s1489_s3] sm:$0xff] }
   0x7   :  { %1092 = vmatpush3.bf16.msra.mxu1 %v1089_v11  ;;  %v1101_v23 = vpack.c.bf16 %v50_v22, %v49_v21  ;;  %v41_v25 = vld [vmem:[%s1486_s0 + $0x38] sm:$0xff]  ;;  %v63_v32 = vmul.f32 %v872_v2, %v40_v24  ;;  %v349_v35 = vld [vmem:[%s1489_s3 + $0x8] sm:$0xff]  ;;  %vm1297_vm3 = vmpackc.low %vm359_vm2, %vm359_vm2 }
   0x8   :  { %1094 = vmatprep.subr.bf16.mxu1 %v1093_v14  ;;  %v1083_v26 = vpack.c.bf16 %v41_v25, %v40_v24  ;;  %v64_v33 = vmul.f32 %v872_v2, %v41_v25  ;;  %v1105_v37 = vpack.c.bf16 %v349_v35, %v348_v34  ;;  %v350_v38 = vld [vmem:[%s1489_s3 + $0x10] sm:$0xff]  ;;  %v351_v39 = vld [vmem:[%s1489_s3 + $0x18] sm:$0xff]  ;;  %v619_v57 = vld [vmem:[%s1490_s7] sm:$0xff] }
   0x9   :  { %v1111_v42 = vpack.c.bf16 %v351_v39, %v350_v38  ;;  %v897_v58 = vld [vmem:[%s1491_s4] ss:$0 sm:$0xff] }
   0xb   :  { %1096 = vmatpush3.bf16.msra.mxu1 %v1093_v14 }
   0xc   :  { %1098 = vmatprep.subr.bf16.mxu1 %v1097_v19 }
   0xd   :  { %1076 = vmatpush3.bf16.xpose.msk.msra.mxu0 %vm1219_vm1, %v1071_v8 }
   0xe   :  { %1079 = vmatprep.subr.msk.bf16.mxu0 %vm1219_vm1, %v1077_v20 }
   0xf   :  { %1100 = vmatpush3.bf16.msra.mxu1 %v1097_v19 }
  0x10   :  { %1102 = vmatprep.subr.bf16.mxu1 %v1101_v23 }
  0x13   :  { %1104 = vmatpush3.bf16.msra.mxu1 %v1101_v23 }
  0x14   :  { %1107 = vmatprep.subr.msk.bf16.mxu1 %vm1297_vm3, %v1105_v37 }
  0x15   :  { %1082 = vmatpush3.bf16.xpose.msk.msra.mxu0 %vm1219_vm1, %v1077_v20 }
  0x16   :  { %1085 = vmatprep.subr.msk.bf16.mxu0 %vm1219_vm1, %v1083_v26 }
  0x1d   :  { %1088 = vmatpush3.bf16.xpose.msk.msra.mxu0 %vm1219_vm1, %v1083_v26 }
  0x1e   :  { %1051 = vmatprep.subr.msk.mxu0 %vm501_vm4, %v619_v57 }
  0x24   :  { %992 = vmatmul.mubr.msk.f32.vlgmr.msra.gmra.mrb[0].mxu0 %vm65_vm0, %v58_v27 }
  0x25   :  { %994 = vmatprep.mubr.msk.f32.mxu0 %vm65_vm0, %v59_v28  ;;  %1052 = vmatpush3.xpose.msk.msra.mxu0 %vm501_vm4, %v619_v57 }
  0x28   :  { %995 = vmatmul.mubr.msk.f32.gmra.mrb[2].mxu0 %vm65_vm0, %v60_v29 }
  0x29   :  { %997 = vmatprep.mubr.msk.f32.mxu0 %vm65_vm0, %v61_v30 }
  0x2c   :  { %998 = vmatmul.mubr.msk.f32.gmra.mrb[4].mxu0 %vm65_vm0, %v62_v31 }
  0x2d   :  { %1000 = vmatprep.mubr.msk.f32.mxu0 %vm65_vm0, %v63_v32 }
  0x30   :  { %1001 = vmatmul.mubr.msk.f32.gmra.mrb[6].mxu0 %vm65_vm0, %v64_v33 }
  0xf7   :  { %v993_v40 = vpop.f32.mrb[0].mxu0 }
  0xf8   :  { %v180_v41 = vpop.f32.mrb[1].mxu0 }
  0xf9   :  { %1019 = vmatprep.mubr.msk.f32.mxu1 %vm65_vm0, %v180_v41 }
  0xfa   :  { %1020 = vmatmul.mubr.msk.f32.vlgmr.msra.gmra.mrb[0].mxu1 %vm65_vm0, %v993_v40 }
  0xfb   :  { %v996_v43 = vpop.f32.mrb[2].mxu0  ;;  %1110 = vmatpush3.bf16.xpose.msk.msra.mxu1 %vm1297_vm3, %v1105_v37 }
  0xfc   :  { %v190_v44 = vpop.f32.mrb[3].mxu0  ;;  %1113 = vmatprep.subr.msk.bf16.mxu1 %vm1297_vm3, %v1111_v42 }
  0xfd   :  { %1022 = vmatprep.mubr.msk.f32.mxu1 %vm65_vm0, %v190_v44 }
  0xfe   :  { %1023 = vmatmul.mubr.msk.f32.gmra.mrb[2].mxu1 %vm65_vm0, %v996_v43 }
  0xff   :  { %v999_v45 = vpop.f32.mrb[4].mxu0 }
 0x100   :  { %v200_v46 = vpop.f32.mrb[5].mxu0 }
 0x101   :  { %1025 = vmatprep.mubr.msk.f32.mxu1 %vm65_vm0, %v200_v46 }
 0x102   :  { %1026 = vmatmul.mubr.msk.f32.gmra.mrb[4].mxu1 %vm65_vm0, %v999_v45 }
 0x103   :  { %v1002_v47 = vpop.f32.mrb[6].mxu0  ;;  %1116 = vmatpush3.bf16.xpose.msk.msra.mxu1 %vm1297_vm3, %v1111_v42 }
 0x104   :  { %v210_v48 = vpop.f32.mrb[7].mxu0  ;;  %1117 = vmatprep.subr.msk.mxu1 %vm501_vm4, %v619_v57 }
 0x105   :  { %1028 = vmatprep.mubr.msk.f32.mxu1 %vm65_vm0, %v210_v48 }
 0x106   :  { %1029 = vmatmul.mubr.msk.f32.gmra.mrb[6].mxu1 %vm65_vm0, %v1002_v47 }
 0x1cd   :  { %v1021_v49 = vpop.f32.mrb[0].mxu1 }
 0x1ce   :  { %v309_v50 = vpop.f32.mrb[1].mxu1 }
 0x1cf   :  { %1039 = vmatprep.mubr.msk.f32.mxu1 %vm359_vm2, %v309_v50 }
 0x1d0   :  { %1040 = vmatmul.mubr.msk.f32.vlgmr.msra.gmra.mrb[8].mxu1 %vm359_vm2, %v1021_v49 }
 0x1d1   :  { %v1024_v51 = vpop.f32.mrb[2].mxu1  ;;  %1118 = vmatpush3.xpose.msk.msra.mxu1 %vm501_vm4, %v619_v57 }
 0x1d2   :  { %v319_v52 = vpop.f32.mrb[3].mxu1 }
 0x1d3   :  { %1042 = vmatprep.mubr.msk.f32.mxu1 %vm359_vm2, %v319_v52 }
 0x1d4   :  { %1043 = vmatmul.mubr.msk.f32.gmra.mrb[10].mxu1 %vm359_vm2, %v1024_v51 }
 0x1d5   :  { %v1027_v53 = vpop.f32.mrb[4].mxu1 }
 0x1d6   :  { %v329_v54 = vpop.f32.mrb[5].mxu1 }
 0x1d7   :  { %1045 = vmatprep.mubr.msk.f32.mxu1 %vm359_vm2, %v329_v54 }
 0x1d8   :  { %1046 = vmatmul.mubr.msk.f32.gmra.mrb[12].mxu1 %vm359_vm2, %v1027_v53 }
 0x1d9   :  { %v1030_v55 = vpop.f32.mrb[6].mxu1 }
 0x1da   :  { %v339_v56 = vpop.f32.mrb[7].mxu1 }
 0x1db   :  { %1048 = vmatprep.mubr.msk.f32.mxu1 %vm359_vm2, %v339_v56 }
 0x1dc   :  { %1049 = vmatmul.mubr.msk.f32.gmra.mrb[14].mxu1 %vm359_vm2, %v1030_v55 }
 0x2a3   :  { %v1041_v59 = vpop.f32.mrb[8].mxu1 }
 0x2a4   :  { %v468_v60 = vadd.f32 %v1041_v59, %v897_v58  ;;  %v462_v61 = vpop.f32.mrb[9].mxu1 }
 0x2a5   :  { %v463_v62 = vadd.f32 %v897_v58, %v462_v61 }
 0x2a6   :  { %503 = vst.msk [vmem:[%s1492_s10 + $0x8] sm:$0xff] %vm501_vm4, %v468_v60  ;;  %v511_v63 = vsel %vm501_vm4, %v468_v60, 0.0 }
 0x2a7   :  { %502 = vst.msk [vmem:[%s1492_s10] sm:$0xff] %vm501_vm4, %v463_v62  ;;  %v510_v0 = vsel %vm501_vm4, %v463_v62, 0.0  ;;  %v1044_v1 = vpop.f32.mrb[10].mxu1 }
 0x2a8   :  { %v512_v2 = vadd.f32 %v511_v63, %v510_v0  ;;  %v478_v3 = vadd.f32 %v1044_v1, %v897_v58  ;;  %v472_v4 = vpop.f32.mrb[11].mxu1 }
 0x2a9   :  { %v473_v5 = vadd.f32 %v897_v58, %v472_v4 }
 0x2aa   :  { %505 = vst.msk [vmem:[%s1492_s10 + $0x18] sm:$0xff] %vm501_vm4, %v478_v3  ;;  %v515_v11 = vsel %vm501_vm4, %v478_v3, 0.0 }
 0x2ab   :  { %504 = vst.msk [vmem:[%s1492_s10 + $0x10] sm:$0xff] %vm501_vm4, %v473_v5  ;;  %v513_v6 = vsel %vm501_vm4, %v473_v5, 0.0  ;;  %v1047_v7 = vpop.f32.mrb[12].mxu1 }
 0x2ac   :  { %v514_v8 = vadd.f32 %v513_v6, %v512_v2  ;;  %v488_v9 = vadd.f32 %v1047_v7, %v897_v58  ;;  %v482_v10 = vpop.f32.mrb[13].mxu1 }
 0x2ad   :  { %v483_v12 = vadd.f32 %v897_v58, %v482_v10 }
 0x2ae   :  { %507 = vst.msk [vmem:[%s1492_s10 + $0x28] sm:$0xff] %vm501_vm4, %v488_v9  ;;  %v516_v13 = vadd.f32 %v515_v11, %v514_v8  ;;  %v519_v19 = vsel %vm501_vm4, %v488_v9, 0.0 }
 0x2af   :  { %506 = vst.msk [vmem:[%s1492_s10 + $0x20] sm:$0xff] %vm501_vm4, %v483_v12  ;;  %v517_v14 = vsel %vm501_vm4, %v483_v12, 0.0  ;;  %v1050_v15 = vpop.f32.mrb[14].mxu1 }
 0x2b0   :  { %v518_v16 = vadd.f32 %v517_v14, %v516_v13  ;;  %v498_v17 = vadd.f32 %v1050_v15, %v897_v58  ;;  %v492_v18 = vpop.f32.mrb[15].mxu1  ;;  %v911_v14 = vld [vmem:[%s1494_s6] ss:$0 sm:$0xff] }
 0x2b1   :  { %v493_v20 = vadd.f32 %v897_v58, %v492_v18 }
 0x2b2   :  { %509 = vst.msk [vmem:[%s1492_s10 + $0x38] sm:$0xff] %vm501_vm4, %v498_v17  ;;  %v520_v21 = vadd.f32 %v519_v19, %v518_v16  ;;  %v523_v24 = vsel %vm501_vm4, %v498_v17, 0.0 }
 0x2b3   :  { %508 = vst.msk [vmem:[%s1492_s10 + $0x30] sm:$0xff] %vm501_vm4, %v493_v20  ;;  %v521_v22 = vsel %vm501_vm4, %v493_v20, 0.0 }
 0x2b4   :  { %v522_v23 = vadd.f32 %v521_v22, %v520_v21 }
 0x2b6   :  { %v524_v25 = vadd.f32 %v523_v24, %v522_v23 }
 0x2b8   :  { %v525_v26 = vrot.slane %v524_v25, 4 }
 0x2ba   :  { %v526_v27 = vadd.f32 %v525_v26, %v524_v25 }
 0x2bc   :  { %v527_v28 = vrot.slane %v526_v27, 2 }
 0x2be   :  { %v528_v29 = vadd.f32 %v527_v28, %v526_v27 }
 0x2c0   :  { %v529_v30 = vrot.slane %v528_v29, 1 }
 0x2c2   :  { %v530_v31 = vadd.f32 %v529_v30, %v528_v29 }
 0x2c4   :  { %v532_v32 = vmul.f32 0.015625, %v530_v31 }
 0x2c6   :  { %v533_v33 = vsub.f32 %v463_v62, %v532_v32  ;;  %v534_v34 = vsub.f32 %v468_v60, %v532_v32  ;;  %v535_v35 = vsub.f32 %v473_v5, %v532_v32  ;;  %v536_v36 = vsub.f32 %v478_v3, %v532_v32 }
 0x2c7   :  { %v537_v37 = vsub.f32 %v483_v12, %v532_v32  ;;  %v538_v38 = vsub.f32 %v488_v9, %v532_v32  ;;  %v539_v39 = vsub.f32 %v493_v20, %v532_v32  ;;  %v540_v40 = vsub.f32 %v498_v17, %v532_v32  ;;  %v910_v9 = vld [vmem:[%s1493_s5] ss:$0 sm:$0xff] }
 0x2c8   :  { %v541_v41 = vmul.f32 %v533_v33, %v533_v33  ;;  %v542_v42 = vmul.f32 %v534_v34, %v534_v34  ;;  %v543_v43 = vmul.f32 %v535_v35, %v535_v35  ;;  %v544_v44 = vmul.f32 %v536_v36, %v536_v36 }
 0x2c9   :  { %v545_v48 = vmul.f32 %v537_v37, %v537_v37  ;;  %v546_v51 = vmul.f32 %v538_v38, %v538_v38  ;;  %v547_v54 = vmul.f32 %v539_v39, %v539_v39  ;;  %v548_v57 = vmul.f32 %v540_v40, %v540_v40 }
 0x2ca   :  { %v549_v45 = vsel %vm501_vm4, %v541_v41, 0.0  ;;  %v550_v46 = vsel %vm501_vm4, %v542_v42, 0.0  ;;  %v552_v49 = vsel %vm501_vm4, %v543_v43, 0.0  ;;  %v554_v52 = vsel %vm501_vm4, %v544_v44, 0.0  ;;  %v912_v43 = vld [vmem:[%s1495_s8] ss:$0 sm:$0xff] }
 0x2cb   :  { %v551_v47 = vadd.f32 %v550_v46, %v549_v45  ;;  %v556_v55 = vsel %vm501_vm4, %v545_v48, 0.0  ;;  %v558_v58 = vsel %vm501_vm4, %v546_v51, 0.0  ;;  %v560_v60 = vsel %vm501_vm4, %v547_v54, 0.0 }
 0x2cc   :  { %v562_v62 = vsel %vm501_vm4, %v548_v57, 0.0 }
 0x2cd   :  { %v553_v50 = vadd.f32 %v552_v49, %v551_v47 }
 0x2cf   :  { %v555_v53 = vadd.f32 %v554_v52, %v553_v50 }
 0x2d1   :  { %v557_v56 = vadd.f32 %v556_v55, %v555_v53 }
 0x2d3   :  { %v559_v59 = vadd.f32 %v558_v58, %v557_v56 }
 0x2d5   :  { %v561_v61 = vadd.f32 %v560_v60, %v559_v59 }
 0x2d7   :  { %v563_v63 = vadd.f32 %v562_v62, %v561_v61 }
 0x2d9   :  { %v564_v0 = vrot.slane %v563_v63, 4 }
 0x2db   :  { %v565_v1 = vadd.f32 %v564_v0, %v563_v63 }
 0x2dd   :  { %v566_v2 = vrot.slane %v565_v1, 2 }
 0x2df   :  { %v567_v3 = vadd.f32 %v566_v2, %v565_v1 }
 0x2e1   :  { %v568_v4 = vrot.slane %v567_v3, 1 }
 0x2e3   :  { %v569_v5 = vadd.f32 %v568_v4, %v567_v3 }
 0x2e5   :  { %v570_v6 = vmul.f32 0.015625, %v569_v5 }
 0x2e7   :  { %v571_v7 = vadd.f32 1e-05, %v570_v6 }
 0x2e9   :  { %1119 = vrsqrt.f32 %v571_v7 }
 0x2f3   :  { %v1120_v8 = vpop.eup %1119 }
 0x2f4   :  { %v578_v10 = vmul.f32 %v1120_v8, %v538_v38  ;;  %v579_v11 = vmul.f32 %v1120_v8, %v539_v39  ;;  %v573_v12 = vmul.f32 %v1120_v8, %v533_v33  ;;  %v577_v13 = vmul.f32 %v1120_v8, %v537_v37 }
 0x2f5   :  { %v574_v15 = vmul.f32 %v1120_v8, %v534_v34  ;;  %v575_v16 = vmul.f32 %v1120_v8, %v535_v35  ;;  %v576_v17 = vmul.f32 %v1120_v8, %v536_v36  ;;  %v580_v18 = vmul.f32 %v1120_v8, %v540_v40 }
 0x2f6   :  { %v594_v19 = vmul.f32 %v910_v9, %v579_v11  ;;  %v588_v20 = vmul.f32 %v910_v9, %v573_v12  ;;  %v592_v21 = vmul.f32 %v910_v9, %v577_v13  ;;  %v593_v22 = vmul.f32 %v910_v9, %v578_v10 }
 0x2f7   :  { %v589_v23 = vmul.f32 %v910_v9, %v574_v15  ;;  %v590_v24 = vmul.f32 %v910_v9, %v575_v16  ;;  %v591_v25 = vmul.f32 %v910_v9, %v576_v17  ;;  %v595_v26 = vmul.f32 %v910_v9, %v580_v18 }
 0x2f8   :  { %v603_v27 = vadd.f32 %v911_v14, %v588_v20  ;;  %v607_v28 = vadd.f32 %v911_v14, %v592_v21  ;;  %v608_v29 = vadd.f32 %v911_v14, %v593_v22  ;;  %v609_v30 = vadd.f32 %v911_v14, %v594_v19 }
 0x2f9   :  { %v604_v31 = vadd.f32 %v911_v14, %v589_v23  ;;  %v605_v32 = vadd.f32 %v911_v14, %v590_v24  ;;  %v606_v36 = vadd.f32 %v911_v14, %v591_v25  ;;  %v610_v38 = vadd.f32 %v911_v14, %v595_v26 }
 0x2fa   :  { %v611_v33 = vmax.f32 %v603_v27, 0.0  ;;  %v615_v37 = vmax.f32 %v607_v28, 0.0  ;;  %v616_v34 = vmax.f32 %v608_v29, 0.0  ;;  %v617_v40 = vmax.f32 %v609_v30, 0.0 }
 0x2fb   :  { %v612_v35 = vmax.f32 %v604_v31, 0.0  ;;  %v613_v39 = vmax.f32 %v605_v32, 0.0  ;;  %v614_v41 = vmax.f32 %v606_v36, 0.0  ;;  %v618_v42 = vmax.f32 %v610_v38, 0.0 }
 0x2fc   :  { %1053 = vmatprep.mubr.msk.f32.mxu0 %vm501_vm4, %v611_v33  ;;  %1059 = vmatprep.mubr.msk.f32.mxu1 %vm501_vm4, %v615_v37 }
 0x2fd   :  { %1054 = vmatmul.mubr.msk.f32.vlgmr.msra.gmra.mrb[8].mxu0 %vm501_vm4, %v612_v35  ;;  %1060 = vmatmul.mubr.msk.f32.vlgmr.msra.gmra.mrb[16].mxu1 %vm501_vm4, %v616_v34 }
 0x2fe   :  { %1056 = vmatprep.mubr.msk.f32.mxu0 %vm501_vm4, %v613_v39  ;;  %1062 = vmatprep.mubr.msk.f32.mxu1 %vm501_vm4, %v617_v40 }
 0x301   :  { %1057 = vmatmul.mubr.msk.f32.gmra.mrb[10].mxu0 %vm501_vm4, %v614_v41  ;;  %1063 = vmatmul.mubr.msk.f32.gmra.mrb[18].mxu1 %vm501_vm4, %v618_v42 }
 0x3d0   :  { %v1055_v44 = vpop.f32.mrb[8].mxu0  ;;  %v1061_v45 = vpop.f32.mrb[16].mxu1 }
 0x3d1   :  { %v726_v46 = vadd.f32 %v1055_v44, %v912_v43  ;;  %v746_v47 = vadd.f32 %v1061_v45, %v912_v43  ;;  %v720_v48 = vpop.f32.mrb[9].mxu0  ;;  %v740_v49 = vpop.f32.mrb[17].mxu1 }
 0x3d2   :  { %v721_v50 = vadd.f32 %v912_v43, %v720_v48  ;;  %v741_v58 = vadd.f32 %v912_v43, %v740_v49 }
 0x3d3   :  { %v775_v51 = vsel %vm759_vm5, %v746_v47, -inf  ;;  %v763_v52 = vsel %vm759_vm5, %v726_v46, -inf }
 0x3d4   :  { %776 = vmax.xlane.f32.xlu1 %v775_v51  ;;  %v1064_v53 = vpop.f32.mrb[18].mxu1  ;;  %764 = vmax.xlane.f32.xlu0 %v763_v52  ;;  %v1058_v54 = vpop.f32.mrb[10].mxu0  ;;  %v760_v61 = vsel %vm759_vm5, %v721_v50, -inf  ;;  %v772_v1 = vsel %vm759_vm5, %v741_v58, -inf }
 0x3d5   :  { %v736_v55 = vadd.f32 %v1058_v54, %v912_v43  ;;  %v730_v56 = vpop.f32.mrb[11].mxu0  ;;  %v750_v57 = vpop.f32.mrb[19].mxu1  ;;  %v756_v62 = vadd.f32 %v1064_v53, %v912_v43 }
 0x3d6   :  { %v731_v59 = vadd.f32 %v912_v43, %v730_v56  ;;  %v751_v63 = vadd.f32 %v912_v43, %v750_v57 }
 0x3d7   :  { %v769_v60 = vsel %vm759_vm5, %v736_v55, -inf  ;;  %v781_v2 = vsel %vm759_vm5, %v756_v62, -inf }
 0x3d8   :  { %770 = vmax.xlane.f32.xlu1 %v769_v60  ;;  %761 = vmax.xlane.f32.xlu0 %v760_v61  ;;  %v766_v0 = vsel %vm759_vm5, %v731_v59, -inf  ;;  %v778_v3 = vsel %vm759_vm5, %v751_v63, -inf }
 0x3dc   :  { %767 = vmax.xlane.f32.xlu1 %v766_v0  ;;  %773 = vmax.xlane.f32.xlu0 %v772_v1 }
 0x3e0   :  { %782 = vmax.xlane.f32.xlu1 %v781_v2  ;;  %779 = vmax.xlane.f32.xlu0 %v778_v3 }
 0x461   :  { %v777_v4 = vpop.xlane.xlu1 %776  ;;  %v765_v5 = vpop.xlane.xlu0 %764 }
 0x462   :  { %v1414_v6 = vsub.f32 %v746_v47, %v777_v4  ;;  %v1416_v7 = vsub.f32 %v726_v46, %v765_v5 }
 0x464   :  { %v794_v8 = vmul.f32 1.442695, %v1416_v7  ;;  %v802_v9 = vmul.f32 1.442695, %v1414_v6 }
 0x465   :  { %v771_v10 = vpop.xlane.xlu1 %770  ;;  %v762_v11 = vpop.xlane.xlu0 %761 }
 0x466   :  { %v1420_v12 = vsub.f32 %v736_v55, %v771_v10  ;;  %v1422_v13 = vsub.f32 %v721_v50, %v762_v11  ;;  %1121 = vpow2.f32 %v794_v8 }
 0x467   :  { %1123 = vpow2.f32 %v802_v9 }
 0x468   :  { %v792_v14 = vmul.f32 1.442695, %v1422_v13  ;;  %v798_v15 = vmul.f32 1.442695, %v1420_v12 }
 0x469   :  { %v768_v16 = vpop.xlane.xlu1 %767  ;;  %v774_v17 = vpop.xlane.xlu0 %773 }
 0x46a   :  { %v1426_v18 = vsub.f32 %v731_v59, %v768_v16  ;;  %v1428_v19 = vsub.f32 %v741_v58, %v774_v17  ;;  %1125 = vpow2.f32 %v792_v14 }
 0x46b   :  { %1127 = vpow2.f32 %v798_v15 }
 0x46c   :  { %v800_v20 = vmul.f32 1.442695, %v1428_v19  ;;  %v796_v21 = vmul.f32 1.442695, %v1426_v18 }
 0x46d   :  { %v783_v22 = vpop.xlane.xlu1 %782  ;;  %v780_v23 = vpop.xlane.xlu0 %779 }
 0x46e   :  { %v1432_v24 = vsub.f32 %v756_v62, %v783_v22  ;;  %v1434_v25 = vsub.f32 %v751_v63, %v780_v23  ;;  %1129 = vpow2.f32 %v800_v20 }
 0x46f   :  { %1131 = vpow2.f32 %v796_v21 }
 0x470   :  { %v806_v26 = vmul.f32 1.442695, %v1432_v24  ;;  %v1122_v27 = vpop.eup %1121  ;;  %v804_v28 = vmul.f32 1.442695, %v1434_v25 }
 0x471   :  { %v811_v29 = vsel %vm759_vm5, %v1122_v27, 0.0  ;;  %v1124_v30 = vpop.eup %1123 }
 0x472   :  { %1133 = vpow2.f32 %v806_v26  ;;  %812 = vadd.xlane.f32.xlu1 %v811_v29  ;;  %v823_v32 = vsel %vm759_vm5, %v1124_v30, 0.0 }
 0x473   :  { %1135 = vpow2.f32 %v804_v28 }
 0x474   :  { %v1126_v31 = vpop.eup %1125 }
 0x475   :  { %v808_v33 = vsel %vm759_vm5, %v1126_v31, 0.0  ;;  %v1128_v37 = vpop.eup %1127 }
 0x476   :  { %824 = vadd.xlane.f32.xlu1 %v823_v32  ;;  %809 = vadd.xlane.f32.xlu0 %v808_v33  ;;  %v817_v35 = vsel %vm759_vm5, %v1128_v37, 0.0 }
 0x478   :  { %v1130_v34 = vpop.eup %1129 }
 0x479   :  { %v820_v36 = vsel %vm759_vm5, %v1130_v34, 0.0  ;;  %v1132_v38 = vpop.eup %1131 }
 0x47a   :  { %818 = vadd.xlane.f32.xlu1 %v817_v35  ;;  %821 = vadd.xlane.f32.xlu0 %v820_v36  ;;  %v814_v41 = vsel %vm759_vm5, %v1132_v38, 0.0 }
 0x47c   :  { %v1134_v39 = vpop.eup %1133 }
 0x47d   :  { %v829_v40 = vsel %vm759_vm5, %v1134_v39, 0.0  ;;  %v1136_v42 = vpop.eup %1135 }
 0x47e   :  { %830 = vadd.xlane.f32.xlu1 %v829_v40  ;;  %815 = vadd.xlane.f32.xlu0 %v814_v41  ;;  %v826_v43 = vsel %vm759_vm5, %v1136_v42, 0.0 }
 0x482   :  { %827 = vadd.xlane.f32.xlu0 %v826_v43 }
 0x4ff   :  { %v813_v44 = vpop.xlane.xlu1 %812 }
 0x500   :  { %1137 = vlog2.f32 %v813_v44 }
 0x503   :  { %v825_v45 = vpop.xlane.xlu1 %824  ;;  %v810_v46 = vpop.xlane.xlu0 %809 }
 0x504   :  { %1139 = vlog2.f32 %v825_v45 }
 0x505   :  { %1141 = vlog2.f32 %v810_v46 }
 0x507   :  { %v819_v47 = vpop.xlane.xlu1 %818  ;;  %v822_v48 = vpop.xlane.xlu0 %821 }
 0x508   :  { %1143 = vlog2.f32 %v819_v47 }
 0x509   :  { %1145 = vlog2.f32 %v822_v48 }
 0x50a   :  { %v1138_v49 = vpop.eup %1137 }
 0x50b   :  { %v835_v50 = vmul.f32 0.6931472, %v1138_v49  ;;  %v831_v51 = vpop.xlane.xlu1 %830  ;;  %v816_v52 = vpop.xlane.xlu0 %815 }
 0x50c   :  { %1147 = vlog2.f32 %v831_v51 }
 0x50d   :  { %v849_v53 = vsub.f32 %v1416_v7, %v835_v50  ;;  %1149 = vlog2.f32 %v816_v52 }
 0x50e   :  { %v1140_v54 = vpop.eup %1139 }
 0x50f   :  { %v1142_v55 = vpop.eup %1141  ;;  %857 = vst.msk [vmem:[%s1496_s9 + $0x8] sm:$0xff] %vm759_vm5, %v849_v53  ;;  %v843_v56 = vmul.f32 0.6931472, %v1140_v54  ;;  %v828_v57 = vpop.xlane.xlu0 %827 }
 0x510   :  { %v833_v58 = vmul.f32 0.6931472, %v1142_v55  ;;  %1151 = vlog2.f32 %v828_v57 }
 0x511   :  { %v853_v59 = vsub.f32 %v1414_v6, %v843_v56 }
 0x512   :  { %v1144_v60 = vpop.eup %1143  ;;  %v848_v61 = vsub.f32 %v1422_v13, %v833_v58 }
 0x513   :  { %v1146_v62 = vpop.eup %1145  ;;  %861 = vst.msk [vmem:[%s1496_s9 + $0x28] sm:$0xff] %vm759_vm5, %v853_v59  ;;  %v839_v63 = vmul.f32 0.6931472, %v1144_v60 }
 0x514   :  { %856 = vst.msk [vmem:[%s1496_s9] sm:$0xff] %vm759_vm5, %v848_v61  ;;  %v841_v0 = vmul.f32 0.6931472, %v1146_v62 }
 0x515   :  { %v851_v1 = vsub.f32 %v1420_v12, %v839_v63 }
 0x516   :  { %v1148_v2 = vpop.eup %1147  ;;  %v852_v3 = vsub.f32 %v1428_v19, %v841_v0 }
 0x517   :  { %v1150_v4 = vpop.eup %1149  ;;  %859 = vst.msk [vmem:[%s1496_s9 + $0x18] sm:$0xff] %vm759_vm5, %v851_v1  ;;  %v847_v5 = vmul.f32 0.6931472, %v1148_v2 }
 0x518   :  { %860 = vst.msk [vmem:[%s1496_s9 + $0x20] sm:$0xff] %vm759_vm5, %v852_v3  ;;  %v837_v6 = vmul.f32 0.6931472, %v1150_v4 }
 0x519   :  { %v855_v7 = vsub.f32 %v1432_v24, %v847_v5 }
 0x51a   :  { %v1152_v8 = vpop.eup %1151  ;;  %v850_v9 = vsub.f32 %v1426_v18, %v837_v6 }
 0x51b   :  { %863 = vst.msk [vmem:[%s1496_s9 + $0x38] sm:$0xff] %vm759_vm5, %v855_v7  ;;  %v845_v10 = vmul.f32 0.6931472, %v1152_v8 }
 0x51c   :  { %858 = vst.msk [vmem:[%s1496_s9 + $0x10] sm:$0xff] %vm759_vm5, %v850_v9 }
 0x51d   :  { %v854_v11 = vsub.f32 %v1434_v25, %v845_v10 }
 0x51f   :  { %862 = vst.msk [vmem:[%s1496_s9 + $0x30] sm:$0xff] %vm759_vm5, %v854_v11 }

</bundles_post_ra>
